<compile_context>
chip_gen: v6e
topology: v6e:2x2x1
jax: 0.10.0
libtpu: 0.0.40
codegen_flags: <defaults>
</compile_context>

<pallas_src>
import functools
import math

import numpy as np
import jax
import jax.numpy as jnp
from jax.experimental import pallas as pl
from jax.experimental.pallas import tpu as pltpu


# ----------------------------------------------------------------------------- kernels
def _cwsa_body(x, cs, w1, b1, w2, b2, f_pad, inv_f, out_dtype):
    """Shared kernel math. x: (T, L); cs: (2*f_pad, T); gate weights act on L lanes."""
    # Fused rfft along T: one MXU matmul producing [Re ; Im] stacked on sublanes.
    y = jnp.dot(cs, x.astype(cs.dtype), preferred_element_type=jnp.float32)  # (2f_pad, L)
    re = y[:f_pad, :]
    im = y[f_pad:, :]
    mag = jnp.sqrt(re * re + im * im)          # zero-padded frequency rows contribute 0

    # Mean over frequency bins: sum * (1/F_true) so padded bins don't bias it.
    m = jnp.sum(mag, axis=0, keepdims=True) * inv_f                          # (1, L)

    # Spectral gate MLP (f32 accumulation, biases kept in f32).
    h = jnp.dot(m.astype(w1.dtype), w1, preferred_element_type=jnp.float32) + b1
    h = jnp.maximum(h, 0.0)
    z = jnp.dot(h.astype(w2.dtype), w2, preferred_element_type=jnp.float32) + b2
    gate = jax.nn.sigmoid(z)                                                 # (1, L) f32

    # Broadcast multiply over T in x's dtype (avoids a full-slab f32 copy for bf16 x).
    return (x * gate.astype(x.dtype)).astype(out_dtype)


def cwsa_packed_kernel(xt_ref, cs_ref, w1_ref, b1_ref, w2_ref, b2_ref, out_ref,
                       *, f_pad, inv_f):
    # xt_ref : (T, BB*D)   BB batch elements packed along the lane dim (lane-dense)
    out_ref[...] = _cwsa_body(xt_ref[...], cs_ref[...], w1_ref[...], b1_ref[...],
                              w2_ref[...], b2_ref[...], f_pad, inv_f, out_ref.dtype)


def cwsa_dense_kernel(x_ref, cs_ref, w1_ref, b1_ref, w2_ref, b2_ref, out_ref,
                      *, f_pad, inv_f):
    # x_ref : (1, T, D)   one batch element per grid step, no wrapper transpose
    out_ref[0] = _cwsa_body(x_ref[0], cs_ref[...], w1_ref[...], b1_ref[...],
                            w2_ref[...], b2_ref[...], f_pad, inv_f, out_ref.dtype)


# ----------------------------------------------------------------------------- helpers
def _const_spec(shape):
    """BlockSpec for a grid-invariant input: whole array, constant index_map,
    single-buffered (double-buffering a constant block is pure VMEM waste)."""
    ndim = len(shape)
    index_map = lambda *_: (0,) * ndim
    try:
        return pl.BlockSpec(shape, index_map, pipeline_mode=pl.Buffered(1))
    except TypeError:   # older jax without pipeline_mode / Buffered
        return pl.BlockSpec(shape, index_map)


def _vmem_limit(budget_bytes):
    # 2x headroom for compiler temporaries; floor at the largest scoped default (32 MiB),
    # cap at v7x physical VMEM (64 MiB) so the request is valid on every generation.
    return int(min(max(2 * budget_bytes, 32 << 20), 64 << 20))


def _dft_matrix(T, F, F_pad, dtype):
    """Stacked zero-padded real-DFT matrix: rows [0:F]=cos, rows [F_pad:F_pad+F]=-sin,
    so rfft along T becomes a single MXU matmul (split re/im with a sublane-aligned slice)."""
    t = np.arange(T)[None, :]
    k = np.arange(F)[:, None]
    ang = 2.0 * np.pi * k * t / T
    cs = np.zeros((2 * F_pad, T), np.float32)
    cs[:F] = np.cos(ang)
    cs[F_pad:F_pad + F] = -np.sin(ang)
    return jnp.asarray(cs, dtype=dtype)


def _pick_packed_block(B, D, H, *, kron_budget=2 << 20, lane_target=1024):
    """Packed-path batch block BB: smallest BB making BB*D a multiple of 128 (lane-dense
    output stores), grown toward ~lane_target lanes while the block-diagonal kron gate
    weights stay under kron_budget bytes, then shrunk (keeping lane density) if that
    would collapse the grid to a single block while the batch allows >= 2 (v7x: 2 TCs)."""
    bb_min = 128 // math.gcd(D, 128)
    bb = bb_min

    def kron_bytes(n):
        return 2 * (n * D) * (n * H) * 4

    while bb * D < lane_target and kron_bytes(2 * bb) <= kron_budget:
        bb *= 2
    while bb > bb_min and pl.cdiv(B, bb) < 2 and ((bb // 2) * D) % 128 == 0:
        bb //= 2
    return bb


# ----------------------------------------------------------------------------- wrapper
def _cwsa_dense(x, w1, b1, w2, b2, cs, F_pad, F, matmul_dtype):
    """D % 128 == 0: grid over batch, (1, T, D) blocks, no transposes, no kron weights."""
    B, T, D = x.shape
    H = w1.shape[1]
    w1m = w1.astype(matmul_dtype)
    w2m = w2.astype(matmul_dtype)
    b1r = b1.reshape(1, H).astype(jnp.float32)
    b2r = b2.reshape(1, D).astype(jnp.float32)

    x_itemsize = jnp.dtype(x.dtype).itemsize
    x_block_bytes = T * D * x_itemsize
    const_bytes = (cs.size * cs.dtype.itemsize
                   + w1m.size * jnp.dtype(matmul_dtype).itemsize
                   + w2m.size * jnp.dtype(matmul_dtype).itemsize
                   + (b1r.size + b2r.size) * 4)
    vmem_limit = _vmem_limit(2 * (2 * x_block_bytes) + const_bytes)

    cost = pl.CostEstimate(
        flops=int(B * (2 * (2 * F_pad) * T * D + 2 * D * H + 2 * H * D
                       + 6 * F_pad * D + 2 * T * D)),
        transcendentals=int(B * (D + F_pad * D)),
        bytes_accessed=int(2 * B * T * D * x_itemsize + const_bytes),
    )

    kernel = functools.partial(cwsa_dense_kernel, f_pad=F_pad, inv_f=1.0 / F)
    return pl.pallas_call(
        kernel,
        out_shape=jax.ShapeDtypeStruct((B, T, D), x.dtype),
        grid=(B,),
        in_specs=[
            pl.BlockSpec((1, T, D), lambda b: (b, 0, 0)),   # per-batch x block
            _const_spec((2 * F_pad, T)),                    # stacked DFT matrix
            _const_spec((D, H)),                            # W1
            _const_spec((1, H)),                            # b1
            _const_spec((H, D)),                            # W2
            _const_spec((1, D)),                            # b2
        ],
        out_specs=pl.BlockSpec((1, T, D), lambda b: (b, 0, 0)),
        compiler_params=pltpu.CompilerParams(
            dimension_semantics=("parallel",), vmem_limit_bytes=vmem_limit),
        cost_estimate=cost,
    )(x, cs, w1m, b1r, w2m, b2r)


def _cwsa_packed(x, w1, b1, w2, b2, cs, F_pad, F, matmul_dtype):
    """D not a multiple of 128: pack BB batch elements along lanes (lane-dense stores)."""
    B, T, D = x.shape
    H = w1.shape[1]
    BB = _pick_packed_block(B, D, H)
    Bp = ((B + BB - 1) // BB) * BB
    xp = x if Bp == B else jnp.concatenate(
        [x, jnp.zeros((Bp - B, T, D), x.dtype)], axis=0)

    # Lane packing (batch-major): lane index = b*D + d.
    # TODO(synk): this wrapper transpose (and its inverse below) each cost one extra HBM
    #   round trip; they can be moved in-kernel with pltpu.einshape (XLU slot overlaps
    #   with the MXU) or fused into the downstream consumer.
    xt = jnp.transpose(xp, (1, 0, 2)).reshape(T, Bp * D)

    # Block-diagonal gate weights: the MLP acts independently per packed batch element
    # without any in-kernel lane<->sublane reshape. BB is bounded so this stays <= ~2 MiB.
    eye = jnp.eye(BB, dtype=jnp.float32)
    w1bd = jnp.kron(eye, w1.astype(jnp.float32)).astype(matmul_dtype)   # (BB*D, BB*H)
    w2bd = jnp.kron(eye, w2.astype(jnp.float32)).astype(matmul_dtype)   # (BB*H, BB*D)
    b1bd = jnp.tile(b1.reshape(1, H).astype(jnp.float32), (1, BB))      # (1, BB*H)
    b2bd = jnp.tile(b2.reshape(1, D).astype(jnp.float32), (1, BB))      # (1, BB*D)

    n_blocks = Bp // BB
    lane = BB * D

    x_itemsize = jnp.dtype(x.dtype).itemsize
    mm_itemsize = jnp.dtype(matmul_dtype).itemsize
    x_block_bytes = T * lane * x_itemsize
    const_bytes = (cs.size * cs.dtype.itemsize
                   + (w1bd.size + w2bd.size) * mm_itemsize
                   + (b1bd.size + b2bd.size) * 4)
    vmem_limit = _vmem_limit(2 * (2 * x_block_bytes) + const_bytes)

    cost = pl.CostEstimate(
        flops=int(2 * (2 * F_pad) * T * Bp * D
                  + n_blocks * (2 * lane * BB * H + 2 * BB * H * lane)
                  + 6 * F_pad * Bp * D + 2 * T * Bp * D),
        transcendentals=int(Bp * D + F_pad * Bp * D),
        bytes_accessed=int(2 * T * Bp * D * x_itemsize + const_bytes),
    )

    kernel = functools.partial(cwsa_packed_kernel, f_pad=F_pad, inv_f=1.0 / F)
    out_t = pl.pallas_call(
        kernel,
        out_shape=jax.ShapeDtypeStruct((T, Bp * D), x.dtype),
        grid=(n_blocks,),
        in_specs=[
            pl.BlockSpec((T, lane), lambda i: (0, i)),      # packed x slab (lane-dense)
            _const_spec((2 * F_pad, T)),                    # stacked DFT matrix
            _const_spec((lane, BB * H)),                    # W1 (block-diag)
            _const_spec((1, BB * H)),                       # b1
            _const_spec((BB * H, lane)),                    # W2 (block-diag)
            _const_spec((1, lane)),                         # b2
        ],
        out_specs=pl.BlockSpec((T, lane), lambda i: (0, i)),
        compiler_params=pltpu.CompilerParams(
            dimension_semantics=("parallel",), vmem_limit_bytes=vmem_limit),
        cost_estimate=cost,
    )(xt, cs, w1bd, b1bd, w2bd, b2bd)

    out = out_t.reshape(T, Bp, D).transpose(1, 0, 2)
    return out[:B]


def cwsa_forward(x, w1, b1, w2, b2, *, matmul_dtype=jnp.float32):
    """x: (B, T, D). w1: (D, H), b1: (H,), w2: (H, D), b2: (D,) (pre-transposed Linear).
    matmul_dtype=bf16 is the recommended MXU setting on v6e/v7x (looser tolerance)."""
    B, T, D = x.shape
    F = T // 2 + 1
    F_pad = ((F + 7) // 8) * 8          # pad frequency bins to a sublane multiple
    cs = _dft_matrix(T, F, F_pad, matmul_dtype)

    if D % 128 == 0:
        return _cwsa_dense(x, w1, b1, w2, b2, cs, F_pad, F, matmul_dtype)
    return _cwsa_packed(x, w1, b1, w2, b2, cs, F_pad, F, matmul_dtype)


# ----------------------------------------------------------------------------- reference
def cwsa_reference(x, w1, b1, w2, b2):
    xf = jnp.fft.rfft(x, axis=1)
    mag = jnp.abs(xf)
    m = mag.mean(axis=1)
    h = jax.nn.relu(m @ w1 + b1)
    gate = jax.nn.sigmoid(h @ w2 + b2)
    return x * gate[:, None, :]


if __name__ == "__main__":
    key = jax.random.PRNGKey(0)

    def make_inputs(B, T, D):
        H = D // 2
        kx, k1, k2, k3, k4 = jax.random.split(jax.random.fold_in(key, D), 5)
        x = jax.random.normal(kx, (B, T, D), dtype=jnp.float32)
        # nn.Linear weights stored pre-transposed so y = x @ W + b.
        w1 = jax.random.normal(k1, (D, H), dtype=jnp.float32) * 0.1
        b1 = jax.random.normal(k2, (H,), dtype=jnp.float32) * 0.1
        w2 = jax.random.normal(k3, (H, D), dtype=jnp.float32) * 0.1
        b2 = jax.random.normal(k4, (D,), dtype=jnp.float32) * 0.1
        return x, w1, b1, w2, b2

    fwd = jax.jit(cwsa_forward, static_argnames=("matmul_dtype",))

    # 1) Packed (lane-dense) path: D < 128, f32 MXU, strict tolerance.
    args = make_inputs(2, 8, 32)            # batch=2, seq=8 (FFT axis), feature_dim=32
    out = fwd(*args)
    jax.block_until_ready(out)
    ref = cwsa_reference(*args)
    np.testing.assert_allclose(np.asarray(out), np.asarray(ref), rtol=1e-4, atol=1e-4)

    # 2) Dense (no-transpose) path: D a multiple of 128, f32 MXU, strict tolerance.
    args2 = make_inputs(3, 16, 128)
    out2 = fwd(*args2)
    jax.block_until_ready(out2)
    ref2 = cwsa_reference(*args2)
    np.testing.assert_allclose(np.asarray(out2), np.asarray(ref2), rtol=1e-4, atol=1e-4)

    # 3) bf16 DFT-matrix path (recommended MXU setting on v6e/v7x) — looser tolerance.
    out3 = fwd(*args, matmul_dtype=jnp.bfloat16)
    jax.block_until_ready(out3)
    np.testing.assert_allclose(np.asarray(out3), np.asarray(ref), rtol=3e-2, atol=3e-2)

    print("KERNEL_OK")
</pallas_src>

<mosaic_0001>
module attributes {stable_mosaic.version = 11 : i64} {
  func.func @cwsa_packed_kernel(%arg0: i32, %arg1: memref<8x128xf32, #tpu.memory_space<vmem>>, %arg2: memref<16x8xf32, #tpu.memory_space<vmem>>, %arg3: memref<128x64xf32, #tpu.memory_space<vmem>>, %arg4: memref<1x64xf32, #tpu.memory_space<vmem>>, %arg5: memref<64x128xf32, #tpu.memory_space<vmem>>, %arg6: memref<1x128xf32, #tpu.memory_space<vmem>>, %arg7: memref<8x128xf32, #tpu.memory_space<vmem>>) attributes {dimension_semantics = [#tpu.dimension_semantics<parallel>], iteration_bounds = array<i64: 1>, scalar_prefetch = 0 : i64, scratch_operands = 0 : i64, tpu.core_type = #tpu.core_type<tc>, window_params = [{transform_indices = @transform_0, window_bounds = array<i64: 8, 128>}, {pipeline_mode = #tpu.pipeline_mode<synchronous>, transform_indices = @transform_1, window_bounds = array<i64: 16, 8>}, {pipeline_mode = #tpu.pipeline_mode<synchronous>, transform_indices = @transform_2, window_bounds = array<i64: 128, 64>}, {pipeline_mode = #tpu.pipeline_mode<synchronous>, transform_indices = @transform_3, window_bounds = array<i64: 1, 64>}, {pipeline_mode = #tpu.pipeline_mode<synchronous>, transform_indices = @transform_4, window_bounds = array<i64: 64, 128>}, {pipeline_mode = #tpu.pipeline_mode<synchronous>, transform_indices = @transform_5, window_bounds = array<i64: 1, 128>}, {transform_indices = @transform_6, window_bounds = array<i64: 8, 128>}]} {
    %c0 = arith.constant 0 : index
    %c0_0 = arith.constant 0 : index
    %0 = vector.load %arg1[%c0, %c0_0] : memref<8x128xf32, #tpu.memory_space<vmem>>, vector<8x128xf32>
    %c0_1 = arith.constant 0 : index
    %c0_2 = arith.constant 0 : index
    %1 = vector.load %arg2[%c0_1, %c0_2] : memref<16x8xf32, #tpu.memory_space<vmem>>, vector<16x8xf32>
    %c0_3 = arith.constant 0 : index
    %c0_4 = arith.constant 0 : index
    %2 = vector.load %arg3[%c0_3, %c0_4] : memref<128x64xf32, #tpu.memory_space<vmem>>, vector<128x64xf32>
    %c0_5 = arith.constant 0 : index
    %c0_6 = arith.constant 0 : index
    %3 = vector.load %arg4[%c0_5, %c0_6] : memref<1x64xf32, #tpu.memory_space<vmem>>, vector<1x64xf32>
    %c0_7 = arith.constant 0 : index
    %c0_8 = arith.constant 0 : index
    %4 = vector.load %arg5[%c0_7, %c0_8] : memref<64x128xf32, #tpu.memory_space<vmem>>, vector<64x128xf32>
    %c0_9 = arith.constant 0 : index
    %c0_10 = arith.constant 0 : index
    %5 = vector.load %arg6[%c0_9, %c0_10] : memref<1x128xf32, #tpu.memory_space<vmem>>, vector<1x128xf32>
    %cst = arith.constant dense<0.000000e+00> : vector<16x128xf32>
    %6 = tpu.matmul %1, %0, %cst {dimension_numbers = #tpu.dot_dimension_numbers<[1], [0], [0], [1], [0, 0, 1, 1], [], []>} : vector<16x8xf32>, vector<8x128xf32>, vector<16x128xf32> -> vector<16x128xf32>
    %7 = vector.extract_strided_slice %6 {offsets = [0, 0], sizes = [8, 128], strides = [1, 1]} : vector<16x128xf32> to vector<8x128xf32>
    %8 = vector.extract_strided_slice %6 {offsets = [8, 0], sizes = [8, 128], strides = [1, 1]} : vector<16x128xf32> to vector<8x128xf32>
    %9 = arith.mulf %7, %7 : vector<8x128xf32>
    %10 = arith.mulf %8, %8 : vector<8x128xf32>
    %11 = arith.addf %9, %10 : vector<8x128xf32>
    %12 = math.sqrt %11 : vector<8x128xf32>
    %cst_11 = arith.constant dense<0.000000e+00> : vector<128xf32>
    %13 = vector.multi_reduction <add>, %12, %cst_11 [0] : vector<8x128xf32> to vector<128xf32>
    %14 = vector.shape_cast %13 : vector<128xf32> to vector<1x128xf32>
    %cst_12 = arith.constant 2.000000e-01 : f32
    %15 = vector.broadcast %cst_12 : f32 to vector<1x128xf32>
    %16 = arith.mulf %14, %15 : vector<1x128xf32>
    %cst_13 = arith.constant dense<0.000000e+00> : vector<1x64xf32>
    %17 = tpu.matmul %16, %2, %cst_13 {dimension_numbers = #tpu.dot_dimension_numbers<[1], [0], [0], [1], [0, 0, 1, 1], [], []>} : vector<1x128xf32>, vector<128x64xf32>, vector<1x64xf32> -> vector<1x64xf32>
    %18 = arith.addf %17, %3 : vector<1x64xf32>
    %cst_14 = arith.constant 0.000000e+00 : f32
    %19 = vector.broadcast %cst_14 : f32 to vector<1x64xf32>
    %20 = arith.maximumf %18, %19 : vector<1x64xf32>
    %cst_15 = arith.constant dense<0.000000e+00> : vector<1x128xf32>
    %21 = tpu.matmul %20, %4, %cst_15 {dimension_numbers = #tpu.dot_dimension_numbers<[1], [0], [0], [1], [0, 0, 1, 1], [], []>} : vector<1x64xf32>, vector<64x128xf32>, vector<1x128xf32> -> vector<1x128xf32>
    %22 = arith.addf %21, %5 : vector<1x128xf32>
    %23 = arith.negf %22 : vector<1x128xf32>
    %24 = math.exp %23 : vector<1x128xf32>
    %cst_16 = arith.constant 1.000000e+00 : f32
    %25 = vector.broadcast %cst_16 : f32 to vector<1x128xf32>
    %26 = arith.addf %25, %24 : vector<1x128xf32>
    %27 = arith.divf %25, %26 : vector<1x128xf32>
    %28 = vector.broadcast %27 : vector<1x128xf32> to vector<8x128xf32>
    %29 = arith.mulf %0, %28 : vector<8x128xf32>
    %c0_17 = arith.constant 0 : index
    %c0_18 = arith.constant 0 : index
    %30 = vector.load %arg7[%c0_17, %c0_18] : memref<8x128xf32, #tpu.memory_space<vmem>>, vector<8x128xf32>
    tpu.vector_store %arg7[%c0_17, %c0_18], %29 {strides = array<i32>} : memref<8x128xf32, #tpu.memory_space<vmem>>, vector<8x128xf32>,
    return
  }
  func.func @transform_0(%arg0: i32) -> (i32, i32) {
    %c0_i32 = arith.constant 0 : i32
    %c0_i32_0 = arith.constant 0 : i32
    return %c0_i32, %arg0 : i32, i32
  }
  func.func @transform_1(%arg0: i32) -> (i32, i32) {
    %c0_i32 = arith.constant 0 : i32
    %c0_i32_0 = arith.constant 0 : i32
    %c0_i32_1 = arith.constant 0 : i32
    return %c0_i32, %c0_i32_0 : i32, i32
  }
  func.func @transform_2(%arg0: i32) -> (i32, i32) {
    %c0_i32 = arith.constant 0 : i32
    %c0_i32_0 = arith.constant 0 : i32
    %c0_i32_1 = arith.constant 0 : i32
    return %c0_i32, %c0_i32_0 : i32, i32
  }
  func.func @transform_3(%arg0: i32) -> (i32, i32) {
    %c0_i32 = arith.constant 0 : i32
    %c0_i32_0 = arith.constant 0 : i32
    %c0_i32_1 = arith.constant 0 : i32
    return %c0_i32, %c0_i32_0 : i32, i32
  }
  func.func @transform_4(%arg0: i32) -> (i32, i32) {
    %c0_i32 = arith.constant 0 : i32
    %c0_i32_0 = arith.constant 0 : i32
    %c0_i32_1 = arith.constant 0 : i32
    return %c0_i32, %c0_i32_0 : i32, i32
  }
  func.func @transform_5(%arg0: i32) -> (i32, i32) {
    %c0_i32 = arith.constant 0 : i32
    %c0_i32_0 = arith.constant 0 : i32
    %c0_i32_1 = arith.constant 0 : i32
    return %c0_i32, %c0_i32_0 : i32, i32
  }
  func.func @transform_6(%arg0: i32) -> (i32, i32) {
    %c0_i32 = arith.constant 0 : i32
    %c0_i32_0 = arith.constant 0 : i32
    return %c0_i32, %arg0 : i32, i32
  }
}

</mosaic_0001>

<bundles_post_ra>
// kernel: cwsa_forward.1
= control target key start
LH: loop header
LB: loop body
LE: loop exit
PB: predicated region body
PF: predicated region fallthrough
CT: control target
= control target key end

     0   :  { %vm52_vm0 = vcmask 64512   ;;  %v412_v3 = vmov 0.0   ;;  %vm413_vm1 = vmmov 0   ;;  %vm222_vm4 = vcmask 523264   ;;  %s570_s0 = inlined_call_operand.vmem [shape: f32[8,128], index: 0, kind: input, shape index: {}]   ;;  %s571_s1 = inlined_call_operand.vmem [shape: f32[16,8], index: 1, kind: input, shape index: {}]   ;;  %s572_s2 = inlined_call_operand.vmem [shape: f32[128,64], index: 2, kind: input, shape index: {}]   ;;  %s573_s4 = inlined_call_operand.vmem [shape: f32[64,128], index: 4, kind: input, shape index: {}]   ;;  %s574_s3 = inlined_call_operand.vmem [shape: f32[1,64], index: 3, kind: input, shape index: {}]   ;;  %s575_s5 = inlined_call_operand.vmem [shape: f32[1,128], index: 5, kind: input, shape index: {}]   ;;  %s576_s6 = inlined_call_operand.vmem [shape: f32[8,128], index: 6, kind: output, shape index: {}]  }
   0x1   :  { %v452_v0 = vld [vmem:[%s570_s0] sm:$0xff]  ;;  %v25_v2 = vld [vmem:[%s571_s1 + $0x8] sm:$0xff]  ;;  %350 = vmatprep.subr.mxu1 %v412_v3  ;;  %v41_v4 = vld [vmem:[%s572_s2 + $0x78] sm:$0xff]  ;;  %382 = vmatprep.mubr.msk.f32.mxu1 %vm413_vm1, %v412_v3  ;;  %v302_v57 = vlaneseq }
   0x2   :  { %v24_v1 = vld [vmem:[%s571_s1] sm:$0xff]  ;;  %345 = vmatprep.subr.mxu0 %v452_v0  ;;  %v40_v5 = vld [vmem:[%s572_s2 + $0x70] sm:$0xff]  ;;  %351 = vmatpush3.msra.mxu1 %v41_v4  ;;  %v39_v6 = vld [vmem:[%s572_s2 + $0x68] sm:$0xff] }
   0x3   :  { %347 = vmatprep.mubr.msk.f32.mxu0 %vm52_vm0, %v24_v1  ;;  %346 = vmatpush3.msra.mxu0 %v452_v0  ;;  %v38_v7 = vld [vmem:[%s572_s2 + $0x60] sm:$0xff]  ;;  %v37_v8 = vld [vmem:[%s572_s2 + $0x58] sm:$0xff]  ;;  %v36_v9 = vld [vmem:[%s572_s2 + $0x50] sm:$0xff]  ;;  %v303_v58 = vshrl.u32 %v302_v57, 7 }
   0x4   :  { %348 = vmatmul.mubr.msk.f32.vlgmr.msra.gmra.mxu0 %vm52_vm0, %v25_v2  ;;  %385 = vmatprep.subr.mxu0 %v412_v3  ;;  %v35_v10 = vld [vmem:[%s572_s2 + $0x48] sm:$0xff]  ;;  %v34_v11 = vld [vmem:[%s572_s2 + $0x40] sm:$0xff]  ;;  %v33_v12 = vld [vmem:[%s572_s2 + $0x38] sm:$0xff] }
   0x5   :  { %352 = vmatprep.subr.mxu1 %v412_v3  ;;  %401 = vmatprep.mubr.msk.f32.mxu0 %vm413_vm1, %v412_v3  ;;  %v32_v13 = vld [vmem:[%s572_s2 + $0x30] sm:$0xff]  ;;  %v31_v14 = vld [vmem:[%s572_s2 + $0x28] sm:$0xff]  ;;  %v30_v15 = vld [vmem:[%s572_s2 + $0x20] sm:$0xff]  ;;  %v304_v59 = vsub.s32 0, %v303_v58 }
   0x6   :  { %353 = vmatpush3.msra.mxu1 %v40_v5  ;;  %v29_v16 = vld [vmem:[%s572_s2 + $0x18] sm:$0xff]  ;;  %v28_v17 = vld [vmem:[%s572_s2 + $0x10] sm:$0xff]  ;;  %v27_v18 = vld [vmem:[%s572_s2 + $0x8] sm:$0xff] }
   0x7   :  { %354 = vmatprep.subr.mxu1 %v412_v3  ;;  %v26_v19 = vld [vmem:[%s572_s2] sm:$0xff]  ;;  %v50_v20 = vld [vmem:[%s573_s4 + $0x38] sm:$0xff]  ;;  %v49_v21 = vld [vmem:[%s573_s4 + $0x30] sm:$0xff] }
   0x8   :  { %355 = vmatpush3.msra.mxu1 %v39_v6  ;;  %386 = vmatpush3.msra.mxu0 %v50_v20  ;;  %v48_v22 = vld [vmem:[%s573_s4 + $0x28] sm:$0xff]  ;;  %v47_v23 = vld [vmem:[%s573_s4 + $0x20] sm:$0xff]  ;;  %v46_v24 = vld [vmem:[%s573_s4 + $0x18] sm:$0xff] }
   0x9   :  { %356 = vmatprep.subr.mxu1 %v412_v3  ;;  %387 = vmatprep.subr.mxu0 %v412_v3  ;;  %v45_v42 = vld [vmem:[%s573_s4 + $0x10] sm:$0xff]  ;;  %v44_v43 = vld [vmem:[%s573_s4 + $0x8] sm:$0xff]  ;;  %v43_v44 = vld [vmem:[%s573_s4] sm:$0xff] }
   0xa   :  { %357 = vmatpush3.msra.mxu1 %v38_v7  ;;  %388 = vmatpush3.msra.mxu0 %v49_v21  ;;  %v42_v45 = vld [vmem:[%s574_s3] sm:$0x1] }
   0xb   :  { %358 = vmatprep.subr.mxu1 %v412_v3  ;;  %389 = vmatprep.subr.mxu0 %v412_v3  ;;  %v51_v50 = vld [vmem:[%s575_s5] sm:$0x1] }
   0xc   :  { %359 = vmatpush3.msra.mxu1 %v37_v8  ;;  %390 = vmatpush3.msra.mxu0 %v48_v22 }
   0xd   :  { %360 = vmatprep.subr.mxu1 %v412_v3  ;;  %391 = vmatprep.subr.mxu0 %v412_v3 }
   0xe   :  { %361 = vmatpush3.msra.mxu1 %v36_v9  ;;  %392 = vmatpush3.msra.mxu0 %v47_v23 }
   0xf   :  { %362 = vmatprep.subr.mxu1 %v412_v3  ;;  %393 = vmatprep.subr.mxu0 %v412_v3 }
  0x10   :  { %363 = vmatpush3.msra.mxu1 %v35_v10  ;;  %394 = vmatpush3.msra.mxu0 %v46_v24 }
  0x11   :  { %364 = vmatprep.subr.mxu1 %v412_v3  ;;  %395 = vmatprep.subr.mxu0 %v412_v3 }
  0x12   :  { %365 = vmatpush3.msra.mxu1 %v34_v11  ;;  %396 = vmatpush3.msra.mxu0 %v45_v42 }
  0x13   :  { %366 = vmatprep.subr.mxu1 %v412_v3  ;;  %397 = vmatprep.subr.mxu0 %v412_v3 }
  0x14   :  { %367 = vmatpush3.msra.mxu1 %v33_v12  ;;  %398 = vmatpush3.msra.mxu0 %v44_v43 }
  0x15   :  { %368 = vmatprep.subr.mxu1 %v412_v3  ;;  %399 = vmatprep.subr.mxu0 %v412_v3 }
  0x16   :  { %369 = vmatpush3.msra.mxu1 %v32_v13  ;;  %400 = vmatpush3.msra.mxu0 %v43_v44 }
  0x17   :  { %370 = vmatprep.subr.mxu1 %v412_v3 }
  0x18   :  { %371 = vmatpush3.msra.mxu1 %v31_v14 }
  0x19   :  { %372 = vmatprep.subr.mxu1 %v412_v3 }
  0x1a   :  { %373 = vmatpush3.msra.mxu1 %v30_v15 }
  0x1b   :  { %374 = vmatprep.subr.mxu1 %v412_v3 }
  0x1c   :  { %375 = vmatpush3.msra.mxu1 %v29_v16 }
  0x1d   :  { %376 = vmatprep.subr.mxu1 %v412_v3 }
  0x1e   :  { %377 = vmatpush3.msra.mxu1 %v28_v17 }
  0x1f   :  { %378 = vmatprep.subr.mxu1 %v412_v3 }
  0x20   :  { %379 = vmatpush3.msra.mxu1 %v27_v18 }
  0x21   :  { %380 = vmatprep.subr.mxu1 %v412_v3 }
  0x22   :  { %381 = vmatpush3.msra.mxu1 %v26_v19 }
  0xc4   :  { %v349_v25 = vpop.f32.mrf.mxu0 }
  0xc5   :  { %v135_v27 = vmul.f32 %v349_v25, %v349_v25 }
  0xc6   :  { %v125_v26 = vpop.f32.mrf.mxu0 }
  0xc7   :  { %v134_v28 = vmul.f32 %v125_v26, %v125_v26 }
  0xc9   :  { %v136_v29 = vadd.f32 %v135_v27, %v134_v28 }
  0xcb   :  { %406 = vrsqrt.f32 %v136_v29  ;;  %vm139_vm2 = vcmp.eq.f32.partialorder %v136_v29, inf  ;;  %v142_v32 = vand.u32 2147483648, %v136_v29  ;;  %vm141_vm3 = vcmp.eq.f32.partialorder %v136_v29, 0.0 }
  0xd8   :  { %v407_v30 = vpop.eup %406 }
  0xd9   :  { %v138_v31 = vmul.f32 %v407_v30, %v136_v29 }
  0xdb   :  { %v140_v33 = vsel %vm139_vm2, %v136_v29, %v138_v31 }
  0xdc   :  { %v143_v34 = vsel %vm141_vm3, %v142_v32, %v140_v33 }
  0xdd   :  { %v144_v35 = vrot.slane %v143_v34, 4 }
  0xdf   :  { %v145_v36 = vadd.f32 %v144_v35, %v143_v34 }
  0xe1   :  { %v146_v37 = vrot.slane %v145_v36, 2 }
  0xe3   :  { %v147_v38 = vadd.f32 %v146_v37, %v145_v36 }
  0xe5   :  { %v148_v39 = vrot.slane %v147_v38, 1 }
  0xe7   :  { %v149_v40 = vadd.f32 %v148_v39, %v147_v38 }
  0xe9   :  { %v150_v41 = vmul.f32 0.2, %v149_v40 }
  0xeb   :  { %383 = vmatmul.mubr.f32.vlgmr.msra.gmra.mxu1 %v150_v41 }
 0x1ab   :  { %v217_v46 = vpop.f32.mrf.mxu1 }
 0x1ac   :  { %v218_v47 = vadd.f32 %v217_v46, %v42_v45 }
 0x1ad   :  { %v384_v48 = vpop.f32.mrf.mxu1 }
 0x1ae   :  { %v221_v49 = vmax.f32 %v218_v47, 0.0 }
 0x1b0   :  { %402 = vmatmul.mubr.msk.f32.vlgmr.msra.gmra.mxu0 %vm222_vm4, %v221_v49 }
 0x270   :  { %v292_v51 = vpop.f32.mrf.mxu0 }
 0x271   :  { %v293_v52 = vadd.f32 %v292_v51, %v51_v50 }
 0x272   :  { %v403_v53 = vpop.f32.mrf.mxu0 }
 0x273   :  { %v315_v54 = vmul.f32 -1.442695, %v293_v52 }
 0x275   :  { %408 = vpow2.f32 %v315_v54 }
 0x282   :  { %v409_v55 = vpop.eup %408 }
 0x283   :  { %v299_v56 = vadd.f32 1.0, %v409_v55 }
 0x285   :  { %410 = vrcp.f32 %v299_v56 }
 0x292   :  { %v411_v60 = vpop.eup %410 }
 0x293   :  { %v305_v61 = vrot.slane %v411_v60, %v304_v59 }
 0x295   :  { %v306_v62 = vmul.f32 %v305_v61, %v452_v0 }
 0x297   :  { %307 = vst [vmem:[%s576_s6] sm:$0xff] %v306_v62 }

</bundles_post_ra>
